<compile_context>
chip_gen: v5e
topology: v5e:2x2
jax: 0.10.0
libtpu: 0.0.40
codegen_flags: <defaults>
</compile_context>

<pallas_src>
import jax
import jax.numpy as jnp
from jax.experimental import pallas as pl
from jax.experimental.pallas import tpu as pltpu


# ---------------------------------------------------------------------------
# Kernels
# ---------------------------------------------------------------------------
def _stage1_kernel(a1_ref, c1_ref, w1_ref, b1_ref, wr_ref, br_ref, x_ref,
                   t1_ref, res_ref):
    """t1 = relu(W1f @ relu(a1*x + c1) + b1f)   (BN1/BN2 folded)
       res = W_res @ x + b_res                   (low-res residual; 1x1 conv commutes
                                                  with nearest upsampling)"""
    x = x_ref[...]
    h = jnp.maximum(a1_ref[...] * x + c1_ref[...], 0.0)
    t = jnp.dot(w1_ref[...], h, preferred_element_type=jnp.float32) + b1_ref[...]
    t1_ref[...] = jnp.maximum(t, 0.0).astype(t1_ref.dtype)
    r = jnp.dot(wr_ref[...], x, preferred_element_type=jnp.float32) + br_ref[...]
    res_ref[...] = r.astype(res_ref.dtype)


def _fused_up_kernel(w2_ref, b2_ref, w3_ref, b3_ref, upad_ref, ures_ref,
                     t1_top_ref, t1_cur_ref, t1_bot_ref, res_ref, o_ref):
    """Row-tile of: 3x3 conv on the x2-upsampled, reflection-padded t1 (BN3 folded)
    -> ReLU -> 1x1 conv -> + upsampled residual.  Inputs are LOW-RES tiles; the
    upsample/pad happens in VMEM (rows: halo blocks + static indexing, cols: 0/1
    selection matmuls)."""
    k = pl.program_id(1)
    nk = pl.num_programs(1)
    p, tr_lo, w = t1_cur_ref.shape
    c_out, tr_out, wo = o_ref.shape

    # --- row halo: reflection pad after x2 nearest upsample only ever needs the
    #     image's border row, so clamping the neighbour block gives exact reflection.
    top = jnp.where(k == 0, t1_top_ref[:, 0:1, :], t1_top_ref[:, tr_lo - 1:tr_lo, :])
    bot = jnp.where(k == nk - 1, t1_bot_ref[:, tr_lo - 1:tr_lo, :], t1_bot_ref[:, 0:1, :])
    y = jnp.concatenate([top, t1_cur_ref[...], bot], axis=1)        # (p, tr_lo+2, w)

    # --- column x2 nearest upsample + reflect-pad(1) as a 0/1 matmul (lane-safe, exact)
    y2 = y.reshape(p * (tr_lo + 2), w)
    yup = jnp.dot(y2, upad_ref[...], preferred_element_type=jnp.float32)
    yup = yup.astype(y.dtype).reshape(p, tr_lo + 2, wo + 2)

    # --- 3 column-shifted copies stacked on the contraction axis (built once/tile)
    ycat = jnp.concatenate(
        [yup[:, :, 0:wo], yup[:, :, 1:wo + 1], yup[:, :, 2:wo + 2]], axis=0)
    yrows = [ycat[:, j, :] for j in range(tr_lo + 2)]                # each (3p, wo)

    # --- residual: column x2 nearest upsample via matmul; row upsample = r//2 below
    res = res_ref[...]
    res_up = jnp.dot(res.reshape(c_out * tr_lo, w), ures_ref[...],
                     preferred_element_type=jnp.float32).reshape(c_out, tr_lo, wo)
    res_rows = [res_up[:, j, :] for j in range(tr_lo)]               # each (c_out, wo)

    w2 = [w2_ref[i] for i in range(3)]                               # (p, 3p) per row tap
    b2 = b2_ref[...]                                                 # (p, 1)
    w3 = w3_ref[...]                                                 # (c_out, p)
    b3 = b3_ref[...]                                                 # (c_out, 1)

    # Per-output-row plain 2D matmuls (contraction depth 3p), statically unrolled.
    # Padded full-res row (r+di) maps to low-res buffer row (r+di+1)//2.
    out_rows = []
    for r in range(tr_out):
        acc = jnp.dot(w2[0], yrows[(r + 1) // 2], preferred_element_type=jnp.float32)
        acc = acc + jnp.dot(w2[1], yrows[(r + 2) // 2],
                            preferred_element_type=jnp.float32)
        acc = acc + jnp.dot(w2[2], yrows[(r + 3) // 2],
                            preferred_element_type=jnp.float32)
        v = jnp.maximum(acc + b2, 0.0)                               # (p, wo)
        o = jnp.dot(w3, v, preferred_element_type=jnp.float32) + b3 + res_rows[r // 2]
        out_rows.append(o[:, None, :])
    o_ref[...] = jnp.concatenate(out_rows, axis=1).astype(o_ref.dtype)


# ---------------------------------------------------------------------------
# Wrapper helpers
# ---------------------------------------------------------------------------
def _bn_affine(bn, eps):
    gamma, beta, mean, var = bn
    a = gamma / jnp.sqrt(var + eps)
    return a, beta - mean * a


def _pick_spatial_tile(hw, max_tile=4096):
    """Largest multiple-of-128 tile (<= max_tile) dividing hw; else the full extent."""
    if hw % 128 != 0:
        return hw
    t = min(max_tile, hw)
    t -= t % 128
    while hw % t:
        t -= 128
    return t


def _pick_row_tile(h, max_rows=8):
    """Largest multiple-of-8 divisor of h that is <= max_rows, else the full height."""
    best = h
    d = 8
    while d <= min(h, max_rows):
        if h % d == 0:
            best = d
        d += 8
    return best


def upsample_bottleneck_forward(x, params, eps=1e-5, upsample=2,
                                intermediate_dtype=None, max_row_tile=8):
    """Forward pass of UpSampleBottleneck (inference-mode BatchNorm)."""
    assert upsample == 2, "kernel specialised for the module's x2 nearest upsample"
    n, c_in, h, w = x.shape
    p = params['w1'].shape[0]                  # planes
    c_out = params['w3'].shape[0]              # planes * expansion
    hw = h * w
    ho, wo = 2 * h, 2 * w
    idt = jnp.dtype(intermediate_dtype) if intermediate_dtype is not None else x.dtype

    # ---- fold inference-mode BatchNorms into the adjacent convs (done once) ----
    a1, c1 = _bn_affine(params['bn1'], eps)    # applied to x before the first ReLU
    a2, c2 = _bn_affine(params['bn2'], eps)    # folded into conv1
    a3, c3 = _bn_affine(params['bn3'], eps)    # folded into conv2 (3x3)
    w1f = a2[:, None] * params['w1']
    b1f = a2 * params['b1'] + c2
    w2f = a3[:, None, None, None] * params['w2']
    b2f = (a3 * params['b2'] + c3).astype(jnp.float32)

    def _full(arr):
        nd = arr.ndim
        return pl.BlockSpec(arr.shape, lambda i, j, _nd=nd: (0,) * _nd)

    # ---- stage 1: (BN1 -> ReLU -> conv1 -> BN2 -> ReLU)  +  residual 1x1 conv ----
    x_flat = x.reshape(n, c_in, hw)
    thw = _pick_spatial_tile(hw)
    s1_ops = (a1.reshape(c_in, 1), c1.reshape(c_in, 1), w1f, b1f.reshape(p, 1),
              params['w_res'], params['b_res'].reshape(c_out, 1))
    s1_cost = pl.CostEstimate(
        flops=2 * n * hw * c_in * (p + c_out) + 4 * n * hw * (c_in + p),
        transcendentals=0,
        bytes_accessed=x.dtype.itemsize * n * c_in * hw
        + idt.itemsize * n * (p + c_out) * hw)

    t1_flat, res_flat = pl.pallas_call(
        _stage1_kernel,
        out_shape=(jax.ShapeDtypeStruct((n, p, hw), idt),
                   jax.ShapeDtypeStruct((n, c_out, hw), idt)),
        grid_spec=pltpu.PrefetchScalarGridSpec(
            num_scalar_prefetch=0,
            grid=(n, hw // thw),
            in_specs=[_full(a) for a in s1_ops]
            + [pl.BlockSpec((None, c_in, thw), lambda i, t: (i, 0, t))],
            out_specs=[pl.BlockSpec((None, p, thw), lambda i, t: (i, 0, t)),
                       pl.BlockSpec((None, c_out, thw), lambda i, t: (i, 0, t))]),
        compiler_params=pltpu.CompilerParams(
            dimension_semantics=("parallel", "parallel"),
            vmem_limit_bytes=64 * 1024 * 1024),
        cost_estimate=s1_cost,
    )(*s1_ops, x_flat)

    # Free (contiguous) reshapes of the low-res intermediates to 4D.
    t1 = t1_flat.reshape(n, p, h, w)
    res_lo = res_flat.reshape(n, c_out, h, w)

    # ---- constant aux tensors for the fused kernel (built once) ----
    # column upsample(+reflect pad) / upsample selection matrices (0/1, exact).
    cp = jnp.arange(wo + 2)
    upad = (jnp.clip((cp[None, :] - 1) // 2, 0, w - 1)
            == jnp.arange(w)[:, None]).astype(idt)                 # (w, wo+2)
    cu = jnp.arange(wo)
    ures = ((cu[None, :] // 2) == jnp.arange(w)[:, None]).astype(idt)   # (w, wo)
    # 3x3 taps repacked as 3 row-offset matrices of depth 3p (dj stacked on contraction).
    w2cat = jnp.stack(
        [jnp.concatenate([w2f[:, :, di, dj] for dj in range(3)], axis=1)
         for di in range(3)], axis=0).astype(idt)                  # (3, p, 3p)

    # ---- fused stage 2+3: row-halo tiled over (batch, row tiles) ----
    tr_lo = _pick_row_tile(h, max_row_tile)
    nk = h // tr_lo
    tr_out = 2 * tr_lo

    t1_spec_cur = pl.BlockSpec((None, p, tr_lo, w), lambda b, k: (b, 0, k, 0))
    t1_spec_top = pl.BlockSpec((None, p, tr_lo, w),
                               lambda b, k: (b, 0, jnp.maximum(k - 1, 0), 0))
    t1_spec_bot = pl.BlockSpec((None, p, tr_lo, w),
                               lambda b, k: (b, 0, jnp.minimum(k + 1, nk - 1), 0))
    res_spec = pl.BlockSpec((None, c_out, tr_lo, w), lambda b, k: (b, 0, k, 0))
    out_spec = pl.BlockSpec((None, c_out, tr_out, wo), lambda b, k: (b, 0, k, 0))

    fused_ops = (w2cat, b2f.reshape(p, 1), params['w3'],
                 params['b3'].reshape(c_out, 1), upad, ures)
    f_cost = pl.CostEstimate(
        flops=2 * n * ho * wo * p * (9 * p + c_out)
        + 2 * n * (h + 2 * nk) * p * w * (wo + 2)
        + 2 * n * h * c_out * w * wo,
        transcendentals=0,
        bytes_accessed=idt.itemsize * n * (3 * p + c_out) * hw
        + x.dtype.itemsize * n * c_out * ho * wo)

    out = pl.pallas_call(
        _fused_up_kernel,
        out_shape=jax.ShapeDtypeStruct((n, c_out, ho, wo), x.dtype),
        grid_spec=pltpu.PrefetchScalarGridSpec(
            num_scalar_prefetch=0,
            grid=(n, nk),
            in_specs=[_full(a) for a in fused_ops]
            + [t1_spec_top, t1_spec_cur, t1_spec_bot, res_spec],
            out_specs=out_spec),
        compiler_params=pltpu.CompilerParams(
            dimension_semantics=("parallel", "parallel"),
            vmem_limit_bytes=64 * 1024 * 1024),
        cost_estimate=f_cost,
    )(*fused_ops, t1, t1, t1, res_lo)

    return out


# ---------------------------------------------------------------------------
# Pure-JAX reference mirroring the PyTorch module (inference-mode BatchNorm)
# ---------------------------------------------------------------------------
def upsample_bottleneck_reference(x, params, eps=1e-5, upsample=2):
    hi = jax.lax.Precision.HIGHEST

    def bn(v, pr):
        gamma, beta, mean, var = pr
        inv = jax.lax.rsqrt(var + eps)
        return ((v - mean[None, :, None, None]) * (gamma * inv)[None, :, None, None]
                + beta[None, :, None, None])

    def conv1x1(v, w, b):
        return jnp.einsum('oc,nchw->nohw', w, v, precision=hi) + b[None, :, None, None]

    def up(v):
        return jnp.repeat(jnp.repeat(v, upsample, axis=2), upsample, axis=3)

    def conv3x3_reflect(v, w, b):
        vp = jnp.pad(v, ((0, 0), (0, 0), (1, 1), (1, 1)), mode='reflect')
        y = jax.lax.conv_general_dilated(
            vp, w, window_strides=(1, 1), padding='VALID',
            dimension_numbers=('NCHW', 'OIHW', 'NCHW'), precision=hi)
        return y + b[None, :, None, None]

    residual = conv1x1(up(x), params['w_res'], params['b_res'])
    h = jax.nn.relu(bn(x, params['bn1']))
    h = conv1x1(h, params['w1'], params['b1'])
    h = jax.nn.relu(bn(h, params['bn2']))
    h = conv3x3_reflect(up(h), params['w2'], params['b2'])
    h = jax.nn.relu(bn(h, params['bn3']))
    h = conv1x1(h, params['w3'], params['b3'])
    return residual + h


if __name__ == "__main__":
    key = jax.random.PRNGKey(0)
    keys = jax.random.split(key, 12)

    N, INPLANES, PLANES, H, W = 2, 4, 4, 16, 16
    EXPANSION, STRIDE = 4, 2
    C_OUT = PLANES * EXPANSION

    def bn_init(k, c):
        kg, kb, km, kv = jax.random.split(k, 4)
        return (1.0 + 0.1 * jax.random.normal(kg, (c,), jnp.float32),   # gamma
                0.1 * jax.random.normal(kb, (c,), jnp.float32),         # beta
                0.1 * jax.random.normal(km, (c,), jnp.float32),         # running_mean
                jax.random.uniform(kv, (c,), jnp.float32, 0.5, 1.5))    # running_var

    params = {
        'bn1': bn_init(keys[0], INPLANES),
        'w1': 0.3 * jax.random.normal(keys[1], (PLANES, INPLANES), jnp.float32),
        'b1': 0.1 * jax.random.normal(keys[2], (PLANES,), jnp.float32),
        'bn2': bn_init(keys[3], PLANES),
        'w2': 0.3 * jax.random.normal(keys[4], (PLANES, PLANES, 3, 3), jnp.float32),
        'b2': 0.1 * jax.random.normal(keys[5], (PLANES,), jnp.float32),
        'bn3': bn_init(keys[6], PLANES),
        'w3': 0.3 * jax.random.normal(keys[7], (C_OUT, PLANES), jnp.float32),
        'b3': 0.1 * jax.random.normal(keys[8], (C_OUT,), jnp.float32),
        'w_res': 0.3 * jax.random.normal(keys[9], (C_OUT, INPLANES), jnp.float32),
        'b_res': 0.1 * jax.random.normal(keys[10], (C_OUT,), jnp.float32),
    }
    x = jax.random.normal(keys[11], (N, INPLANES, H, W), jnp.float32)

    # H=16 with tr_lo=8 -> 2 row tiles per image: exercises the halo / reflection logic
    # at both image borders and across an interior tile boundary.
    out = upsample_bottleneck_forward(x, params, upsample=STRIDE)
    out = jax.block_until_ready(out)

    ref = upsample_bottleneck_reference(x, params, upsample=STRIDE)
    assert out.shape == (N, C_OUT, H * STRIDE, W * STRIDE), out.shape
    max_err = float(jnp.max(jnp.abs(out - ref)))
    assert jnp.allclose(out, ref, atol=1e-3, rtol=1e-3), f"max |err| = {max_err}"

    print("KERNEL_OK")
</pallas_src>

<mosaic_0001>
module attributes {stable_mosaic.version = 11 : i64} {
  func.func @_stage1_kernel(%arg0: i32, %arg1: i32, %arg2: memref<4x1xf32, #tpu.memory_space<vmem>>, %arg3: memref<4x1xf32, #tpu.memory_space<vmem>>, %arg4: memref<4x4xf32, #tpu.memory_space<vmem>>, %arg5: memref<4x1xf32, #tpu.memory_space<vmem>>, %arg6: memref<16x4xf32, #tpu.memory_space<vmem>>, %arg7: memref<16x1xf32, #tpu.memory_space<vmem>>, %arg8: memref<1x4x256xf32, #tpu.memory_space<vmem>>, %arg9: memref<1x4x256xf32, #tpu.memory_space<vmem>>, %arg10: memref<1x16x256xf32, #tpu.memory_space<vmem>>) attributes {dimension_semantics = [#tpu.dimension_semantics<parallel>, #tpu.dimension_semantics<parallel>], iteration_bounds = array<i64: 2, 1>, scalar_prefetch = 0 : i64, scratch_operands = 0 : i64, tpu.core_type = #tpu.core_type<tc>, window_params = [{pipeline_mode = #tpu.pipeline_mode<synchronous>, transform_indices = @transform_0, window_bounds = array<i64: 4, 1>}, {pipeline_mode = #tpu.pipeline_mode<synchronous>, transform_indices = @transform_1, window_bounds = array<i64: 4, 1>}, {pipeline_mode = #tpu.pipeline_mode<synchronous>, transform_indices = @transform_2, window_bounds = array<i64: 4, 4>}, {pipeline_mode = #tpu.pipeline_mode<synchronous>, transform_indices = @transform_3, window_bounds = array<i64: 4, 1>}, {pipeline_mode = #tpu.pipeline_mode<synchronous>, transform_indices = @transform_4, window_bounds = array<i64: 16, 4>}, {pipeline_mode = #tpu.pipeline_mode<synchronous>, transform_indices = @transform_5, window_bounds = array<i64: 16, 1>}, {transform_indices = @transform_6, window_bounds = array<i64: 1, 4, 256>}, {transform_indices = @transform_7, window_bounds = array<i64: 1, 4, 256>}, {transform_indices = @transform_8, window_bounds = array<i64: 1, 16, 256>}]} {
    %c0 = arith.constant 0 : index
    %c0_0 = arith.constant 0 : index
    %c0_1 = arith.constant 0 : index
    %0 = vector.load %arg8[%c0, %c0_0, %c0_1] : memref<1x4x256xf32, #tpu.memory_space<vmem>>, vector<1x4x256xf32>
    %1 = vector.shape_cast %0 : vector<1x4x256xf32> to vector<4x256xf32>
    %c0_2 = arith.constant 0 : index
    %c0_3 = arith.constant 0 : index
    %2 = vector.load %arg2[%c0_2, %c0_3] : memref<4x1xf32, #tpu.memory_space<vmem>>, vector<4x1xf32>
    %3 = vector.broadcast %2 : vector<4x1xf32> to vector<4x256xf32>
    %4 = arith.mulf %3, %1 : vector<4x256xf32>
    %c0_4 = arith.constant 0 : index
    %c0_5 = arith.constant 0 : index
    %5 = vector.load %arg3[%c0_4, %c0_5] : memref<4x1xf32, #tpu.memory_space<vmem>>, vector<4x1xf32>
    %6 = vector.broadcast %5 : vector<4x1xf32> to vector<4x256xf32>
    %7 = arith.addf %4, %6 : vector<4x256xf32>
    %cst = arith.constant 0.000000e+00 : f32
    %8 = vector.broadcast %cst : f32 to vector<4x256xf32>
    %9 = arith.maximumf %7, %8 : vector<4x256xf32>
    %c0_6 = arith.constant 0 : index
    %c0_7 = arith.constant 0 : index
    %10 = vector.load %arg4[%c0_6, %c0_7] : memref<4x4xf32, #tpu.memory_space<vmem>>, vector<4x4xf32>
    %cst_8 = arith.constant dense<0.000000e+00> : vector<4x256xf32>
    %11 = tpu.matmul %10, %9, %cst_8 {dimension_numbers = #tpu.dot_dimension_numbers<[1], [0], [0], [1], [0, 0, 1, 1], [], []>} : vector<4x4xf32>, vector<4x256xf32>, vector<4x256xf32> -> vector<4x256xf32>
    %c0_9 = arith.constant 0 : index
    %c0_10 = arith.constant 0 : index
    %12 = vector.load %arg5[%c0_9, %c0_10] : memref<4x1xf32, #tpu.memory_space<vmem>>, vector<4x1xf32>
    %13 = vector.broadcast %12 : vector<4x1xf32> to vector<4x256xf32>
    %14 = arith.addf %11, %13 : vector<4x256xf32>
    %cst_11 = arith.constant 0.000000e+00 : f32
    %15 = vector.broadcast %cst_11 : f32 to vector<4x256xf32>
    %16 = arith.maximumf %14, %15 : vector<4x256xf32>
    %c0_12 = arith.constant 0 : index
    %c0_13 = arith.constant 0 : index
    %c0_14 = arith.constant 0 : index
    %17 = vector.load %arg9[%c0_12, %c0_13, %c0_14] : memref<1x4x256xf32, #tpu.memory_space<vmem>>, vector<1x4x256xf32>
    %18 = vector.shape_cast %17 : vector<1x4x256xf32> to vector<4x256xf32>
    %19 = vector.shape_cast %16 : vector<4x256xf32> to vector<1x4x256xf32>
    tpu.vector_store %arg9[%c0_12, %c0_13, %c0_14], %19 {strides = array<i32>} : memref<1x4x256xf32, #tpu.memory_space<vmem>>, vector<1x4x256xf32>,
    %c0_15 = arith.constant 0 : index
    %c0_16 = arith.constant 0 : index
    %20 = vector.load %arg6[%c0_15, %c0_16] : memref<16x4xf32, #tpu.memory_space<vmem>>, vector<16x4xf32>
    %cst_17 = arith.constant dense<0.000000e+00> : vector<16x256xf32>
    %21 = tpu.matmul %20, %1, %cst_17 {dimension_numbers = #tpu.dot_dimension_numbers<[1], [0], [0], [1], [0, 0, 1, 1], [], []>} : vector<16x4xf32>, vector<4x256xf32>, vector<16x256xf32> -> vector<16x256xf32>
    %c0_18 = arith.constant 0 : index
    %c0_19 = arith.constant 0 : index
    %22 = vector.load %arg7[%c0_18, %c0_19] : memref<16x1xf32, #tpu.memory_space<vmem>>, vector<16x1xf32>
    %23 = vector.broadcast %22 : vector<16x1xf32> to vector<16x256xf32>
    %24 = arith.addf %21, %23 : vector<16x256xf32>
    %c0_20 = arith.constant 0 : index
    %c0_21 = arith.constant 0 : index
    %c0_22 = arith.constant 0 : index
    %25 = vector.load %arg10[%c0_20, %c0_21, %c0_22] : memref<1x16x256xf32, #tpu.memory_space<vmem>>, vector<1x16x256xf32>
    %26 = vector.shape_cast %25 : vector<1x16x256xf32> to vector<16x256xf32>
    %27 = vector.shape_cast %24 : vector<16x256xf32> to vector<1x16x256xf32>
    tpu.vector_store %arg10[%c0_20, %c0_21, %c0_22], %27 {strides = array<i32>} : memref<1x16x256xf32, #tpu.memory_space<vmem>>, vector<1x16x256xf32>,
    return
  }
  func.func @transform_0(%arg0: i32, %arg1: i32) -> (i32, i32) {
    %c0_i32 = arith.constant 0 : i32
    %c0_i32_0 = arith.constant 0 : i32
    %c0_i32_1 = arith.constant 0 : i32
    return %c0_i32, %c0_i32_0 : i32, i32
  }
  func.func @transform_1(%arg0: i32, %arg1: i32) -> (i32, i32) {
    %c0_i32 = arith.constant 0 : i32
    %c0_i32_0 = arith.constant 0 : i32
    %c0_i32_1 = arith.constant 0 : i32
    return %c0_i32, %c0_i32_0 : i32, i32
  }
  func.func @transform_2(%arg0: i32, %arg1: i32) -> (i32, i32) {
    %c0_i32 = arith.constant 0 : i32
    %c0_i32_0 = arith.constant 0 : i32
    %c0_i32_1 = arith.constant 0 : i32
    return %c0_i32, %c0_i32_0 : i32, i32
  }
  func.func @transform_3(%arg0: i32, %arg1: i32) -> (i32, i32) {
    %c0_i32 = arith.constant 0 : i32
    %c0_i32_0 = arith.constant 0 : i32
    %c0_i32_1 = arith.constant 0 : i32
    return %c0_i32, %c0_i32_0 : i32, i32
  }
  func.func @transform_4(%arg0: i32, %arg1: i32) -> (i32, i32) {
    %c0_i32 = arith.constant 0 : i32
    %c0_i32_0 = arith.constant 0 : i32
    %c0_i32_1 = arith.constant 0 : i32
    return %c0_i32, %c0_i32_0 : i32, i32
  }
  func.func @transform_5(%arg0: i32, %arg1: i32) -> (i32, i32) {
    %c0_i32 = arith.constant 0 : i32
    %c0_i32_0 = arith.constant 0 : i32
    %c0_i32_1 = arith.constant 0 : i32
    return %c0_i32, %c0_i32_0 : i32, i32
  }
  func.func @transform_6(%arg0: i32, %arg1: i32) -> (i32, i32, i32) {
    %c0_i32 = arith.constant 0 : i32
    %c0_i32_0 = arith.constant 0 : i32
    return %arg0, %c0_i32, %arg1 : i32, i32, i32
  }
  func.func @transform_7(%arg0: i32, %arg1: i32) -> (i32, i32, i32) {
    %c0_i32 = arith.constant 0 : i32
    %c0_i32_0 = arith.constant 0 : i32
    return %arg0, %c0_i32, %arg1 : i32, i32, i32
  }
  func.func @transform_8(%arg0: i32, %arg1: i32) -> (i32, i32, i32) {
    %c0_i32 = arith.constant 0 : i32
    %c0_i32_0 = arith.constant 0 : i32
    return %arg0, %c0_i32, %arg1 : i32, i32, i32
  }
}

</mosaic_0001>

<bundles_post_ra>
// kernel: tpu_custom_call.1
= control target key start
LH: loop header
LB: loop body
LE: loop exit
PB: predicated region body
PF: predicated region fallthrough
CT: control target
= control target key end

     0   :  { %s1080_s0 = inlined_call_operand.vmem [shape: f32[4,1], index: 0, kind: input, shape index: {}]   ;;  %s1081_s1 = inlined_call_operand.vmem [shape: f32[4,1], index: 1, kind: input, shape index: {}]   ;;  %s1082_s2 = inlined_call_operand.vmem [shape: f32[4,4], index: 2, kind: input, shape index: {}]   ;;  %s1083_s3 = inlined_call_operand.vmem [shape: f32[4,1], index: 3, kind: input, shape index: {}]   ;;  %s1084_s4 = inlined_call_operand.vmem [shape: f32[16,4], index: 4, kind: input, shape index: {}]   ;;  %s1085_s5 = inlined_call_operand.vmem [shape: f32[16,1], index: 5, kind: input, shape index: {}]   ;;  %s1086_s6 = inlined_call_operand.vmem [shape: f32[2,4,256], index: 6, kind: input, shape index: {}]   ;;  %s1087_s7 = inlined_call_operand.hbm [shape: f32[2,4,256], index: 7, kind: output, shape index: {0}]   ;;  %s1088_s8 = inlined_call_operand.hbm [shape: f32[2,16,256], index: 8, kind: output, shape index: {1}]  }
   0x1   :  { %1089 = sst [smem:[#allocation8_spill]] %s1080_s0 }
   0x2   :  { %1090 = sst [smem:[#allocation9_spill]] %s1081_s1 }
   0x3   :  { %1091 = sst [smem:[#allocation10_spill]] %s1082_s2 }
   0x4   :  { %14 = vsyncpa [#allocation3], 0 }
   0x5   :  { %16 = vsyncpa [#allocation3 + $0x1], 0 }
   0x6   :  { %17 = vsyncpa [#allocation5], 0 }
   0x7   :  { %19 = vsyncpa [#allocation5 + $0x1], 0  ;;  %s928_s27 = smov 0   ;;  %s930_s28 = smov 0  }
   0x8   :  { %s932_s29 = smov 0   ;;  %s934_s30 = smov 0  }
   0x9   :  { %s936_s9 = smov 0   ;;  %s938_s10 = smov 0  }
   0xa LB: > { %s672_s11 = sadd.s32 4294967295, %s878_s10   ;;  %s673_s12 = sadd.s32 4294967294, %s878_s10   ;;  %s878_s10 = sphi %s938_s10, %s25_s10   ;;  %s874_s9 = sphi %s936_s9, %s1101_s9   ;;  %s870_s30 = sphi %s934_s30, %s1100_s30   ;;  %s866_s29 = sphi %s932_s29, %s1099_s29   ;;  %s862_s28 = sphi %s930_s28, %s1098_s28   ;;  %s858_s27 = sphi %s928_s27, %s1097_s27  }
   0xb   : > { %s37_s13 = sadd.s32 1, %s874_s9  ;;  %s200_s14 = sadd.s32 1, %s866_s29 }
   0xc   : > { %p39_p0 = scmp.ge.s32.totalorder %s37_s13, 2  ;;  %p210_p1 = scmp.ne.s32.totalorder %s866_s29, %s862_s28 }
   0xd   : > { %p211_p2 = scmp.eq.s32.totalorder %s672_s11, 1  ;;  %p216_p3 = scmp.ne.s32.totalorder %s862_s28, %s858_s27 }
   0xe   : > { %s1103_s13 = smov (%p39_p0, %s37_s13), 0  ;;  %p217_p5 = scmp.eq.s32.totalorder %s673_s12, 1 }
   0xf   : > { %p968_p4 = por %p211_p2, %p210_p1  ;;  %s195_s16 = ssub.s32 %s874_s9, %s1103_s13 }
  0x10   : > { %p676_p6 = scmp.ge.s32.totalorder %s878_s10, 1  ;;  %p198_p7 = scmp.eq.s32.totalorder %s195_s16, 0 }
  0x11   : > { %p975_p8 = por %p217_p5, %p216_p3  ;;  %p294_p9 = scmp.lt.s32.totalorder %s878_s10, 3 }
  0x12   : > { %s981_s18 = scalar_select %p198_p7, %s866_s29, %s200_s14  }
  0x13   : > { %p295_p10 = pnand %p676_p6, %p294_p9 }
  0x14   : > { %s1094_s0 = sld [smem:[#allocation8_spill]] (!%p295_p10)  ;;  %p338_p11 = scmp.lt.s32.totalorder (!%p295_p10), %s870_s30, 1 }
  0x15   : > { %298 = sbr.rel (%p295_p10) target bundleno = 292 (0x124), region = 48  ;;  %s1095_s1 = sld [smem:[#allocation9_spill]] (!%p295_p10) }
  0x16   : > { %s1096_s2 = sld [smem:[#allocation10_spill]] (!%p295_p10)  ;;  %s1023_s12 = sand.u32 (!%p295_p10), 1, %s862_s28  }
  0x17   : > { %s678_s14 = sshll.u32 (!%p295_p10), %s1023_s12, 5  ;;  %s701_s16 = sshll.u32 (!%p295_p10), %s870_s30, 5 }
  0x18   : > { %s336_s19 = scalar_lea.vmem (!%p295_p10), [#allocation4], %s678_s14  ;;  %s553_s22 = scalar_lea.hbm (!%p295_p10), %s1088_s8, %s701_s16 }
  0x19   : > { %s523_s25 = scalar_lea.sflag (!%p295_p10), [#allocation5], %s1023_s12  ;;  %s788_s20 = scalar_lea.hbm (!%p295_p10), %s1088_s8, 64 }
  0x1a   : > { %v350_v0 = vld [vmem:[%s1094_s0] sm:$0xf]  ;;  %v880_v1 = vmov 0   ;;  %s339_s23 = scalar_select %p338_p11, %s870_s30, 1  ;;  %vm385_vm0 = vcmask 1043456   ;;  %vm381_vm1 = vcmask 31744  }
  0x1b   : > { %765 = vset.pattern.permute.xlu0 %v880_v1  ;;  %766 = vset.pattern.permute.xlu1 %v880_v1  ;;  %v364_v2 = vld [vmem:[%s1095_s1] sm:$0xf]  ;;  %v441_v9 = vld [vmem:[%s1084_s4 + $0x8] sm:$0xff] }
  0x1c   : > { %353 = vperm.xlu0 %765, %v350_v0   ;;  %767 = vset.pattern.permute.xlu2 %v880_v1  ;;  %s699_s24 = sshll.u32 %s339_s23, 3  ;;  %v440_v6 = vld [vmem:[%s1084_s4] sm:$0xff]  ;;  %v443_v11 = vld [vmem:[%s1085_s5 + $0x8] sm:$0xff]  ;;  %s554_s23 = sshll.u32 %s336_s19, 4  ;;  %s555_s23 = int_to_ptr.vmem [resolvable:$true] %s554_s23 }
  0x1d   : > { %s345_s11 = scalar_lea.vmem %s1086_s6, %s699_s24  ;;  %v375_v10 = vld [vmem:[%s1083_s3] sm:$0xf]  ;;  %451 = vperm.xlu2 %767, %v443_v11   ;;  %s556_s24 = sshll.u32 %s553_s22, 4  ;;  %s557_s24 = int_to_ptr.hbm [resolvable:$true] %s556_s24 }
  0x1e   : > { %v349_v3 = vld [vmem:[%s345_s11] sm:$0xff]  ;;  %378 = vperm.xlu1 %766, %v375_v10   ;;  %s782_s26 = sshra.s32 %s557_s24, 4  ;;  %s783_s26 = int_to_ptr.hbm [resolvable:$true] %s782_s26 }
  0x1f   : > { %357 = vst [vmem:[#allocation1] ss:$2 sm:$0xff] %v349_v3  ;;  %v442_v12 = vld [vmem:[%s1085_s5] sm:$0xff]  ;;  %s784_s11 = scalar_lea.hbm %s783_s26, 32  ;;  %p789_p1 = scmp.lt.s32.totalorder %s783_s26, %s1088_s8 }
  0x20   : > { %v374_v21 = vld [vmem:[%s1096_s2] sm:$0xf]  ;;  %p785_p12 = scmp.ne.s32.totalorder %s783_s26, %s784_s11  ;;  %p790_p2 = scmp.lt.s32.totalorder %s788_s20, %s784_s11 }
  0x22   : > { %p786_p13 = pnand %p785_p12, %p968_p4  ;;  %p791_p3 = por %p790_p2, %p789_p1 }
  0x24   : > { %367 = vperm.xlu0 %765, %v364_v2   ;;  %p787_p0 = pneg %p786_p13 }
  0x26   : > { %v358_v4 = vld.sshfl [vmem:[#allocation1] sm:$0xff pattern:$0x75316420]  ;;  %v359_v5 = vld.sshfl [vmem:[#allocation1 + $0x8] sm:$0xff pattern:$0x75316420]  ;;  %446 = vperm.xlu1 %766, %v442_v12   ;;  %p792_p5 = pnand %p791_p3, %p787_p0 }
  0x27   : > { %454 = vst [vmem:[#allocation1] ss:$2 sm:$0xff] %v349_v3 }
  0x2e   : > { %v455_v7 = vld.sshfl [vmem:[#allocation1] sm:$0xff pattern:$0x75316420]  ;;  %v456_v8 = vld.sshfl [vmem:[#allocation1 + $0x8] sm:$0xff pattern:$0x75316420] }
  0x2f   : > { %685 = vmatpush.msk.msra.mxu2 %vm385_vm0, %v455_v7  ;;  %688 = vmatpush.msk.msra.mxu3 %vm385_vm0, %v456_v8 }
  0x30   : > { %686 = vmatmul.msk.f32.vlgmr.msra.gmra.mxu2 %vm381_vm1, %v440_v6  ;;  %689 = vmatmul.msk.f32.vlgmr.msra.gmra.mxu3 %vm381_vm1, %v440_v6 }
  0x38   : > { %687 = vmatmul.msk.f32.gmra.mxu2 %vm381_vm1, %v441_v9  ;;  %690 = vmatmul.msk.f32.gmra.mxu3 %vm381_vm1, %v441_v9 }
  0x77   : > { %v452_v28 = vpop.permute.xlu2 %451 }
  0x8e   : > { %v354_v13 = vpop.permute.xlu0 %353 }
  0x8f   : > { %v362_v14 = vmul.f32 %v358_v4, %v354_v13  ;;  %v363_v15 = vmul.f32 %v359_v5, %v354_v13 }
  0x90   : > { %v379_v22 = vpop.permute.xlu1 %378 }
  0x96   : > { %v368_v16 = vpop.permute.xlu0 %367 }
  0x97   : > { %v370_v17 = vadd.f32 %v368_v16, %v362_v14  ;;  %v371_v18 = vadd.f32 %v368_v16, %v363_v15 }
  0x98   : > { %v447_v23 = vpop.permute.xlu1 %446 }
  0x99   : > { %v372_v19 = vmax.f32 %v370_v17, 0.0  ;;  %v373_v20 = vmax.f32 %v371_v18, 0.0 }
  0x9b   : > { %681 = vmatpush.msk.msra.mxu0 %vm385_vm0, %v372_v19  ;;  %683 = vmatpush.msk.msra.mxu1 %vm385_vm0, %v373_v20 }
  0x9c   : > { %682 = vmatmul.msk.f32.vlgmr.msra.gmra.mxu0 %vm381_vm1, %v374_v21  ;;  %684 = vmatmul.msk.f32.vlgmr.msra.gmra.mxu1 %vm381_vm1, %v374_v21 }
  0xb3   : > { %v484_v24 = vpop.f32.mrf.mxu2  ;;  %v507_v26 = vpop.f32.mrf.mxu3 }
  0xb4   : > { %v485_v25 = vadd.f32 %v484_v24, %v447_v23  ;;  %v508_v27 = vadd.f32 %v507_v26, %v447_v23 }
  0xb6   : > { %513 = vst [vmem:[%s336_s19] sm:$0xff] %v485_v25 }
  0xb7   : > { %514 = vst [vmem:[%s336_s19 + $0x8] sm:$0xff] %v508_v27 }
  0xbb   : > { %v487_v29 = vpop.f32.mrf.mxu2  ;;  %v510_v31 = vpop.f32.mrf.mxu3 }
  0xbc   : > { %v488_v30 = vadd.f32 %v487_v29, %v452_v28  ;;  %v511_v32 = vadd.f32 %v510_v31, %v452_v28 }
  0xbe   : > { %515 = vst [vmem:[%s336_s19 + $0x10] sm:$0xff] %v488_v30 }
  0xbf   : > { %516 = vst [vmem:[%s336_s19 + $0x18] sm:$0xff] %v511_v32 }
  0xc0   : > { %795 = shalt.err (!%p792_p5)
}
  0xc1   : > { %s881_s19 = smov 256   ;;  %s882_s0 = smov 16  }
  0xc2   : > { %703 = dma.vmem_to_hbm [thread:$0]  (%p968_p4), %s555_s23, 512, %s557_s24, %s523_s25, %s881_s19, %s881_s19, %s882_s0  }
  0xc3   : > { %s677_s1 = sshll.u32 %s1023_s12, 3  ;;  %s700_s2 = sshll.u32 %s870_s30, 3 }
  0xc4   : > { %s536_s26 = scalar_lea.hbm %s1087_s7, %s700_s2  ;;  %s329_s11 = scalar_lea.vmem [#allocation2], %s677_s1 }
  0xc5   : > { %s538_s20 = sshll.u32 %s329_s11, 4  ;;  %s540_s21 = sshll.u32 %s536_s26, 4  ;;  %s539_s20 = int_to_ptr.vmem [resolvable:$true] %s538_s20  ;;  %s541_s21 = int_to_ptr.hbm [resolvable:$true] %s540_s21 }
  0xc6   : > { %s518_s0 = scalar_lea.sflag [#allocation3], %s1023_s12  ;;  %s810_s30 = sshra.s32 %s541_s21, 4  ;;  %s811_s30 = int_to_ptr.hbm [resolvable:$true] %s810_s30 }
  0xc7   : > { %s812_s23 = scalar_lea.hbm %s811_s30, 8  ;;  %s816_s1 = scalar_lea.hbm %s1087_s7, 16 }
  0xc8   : > { %p813_p6 = scmp.ne.s32.totalorder %s811_s30, %s812_s23  ;;  %p817_p10 = scmp.lt.s32.totalorder %s811_s30, %s1087_s7 }
  0xc9   : > { %p818_p11 = scmp.lt.s32.totalorder %s816_s1, %s812_s23 }
  0xca   : > { %p814_p7 = pnand %p813_p6, %p968_p4 }
  0xcb   : > { %p819_p12 = por %p818_p11, %p817_p10 }
  0xcc   : > { %p815_p9 = pneg %p814_p7 }
  0xce   : > { %p820_p13 = pnand %p819_p12, %p815_p9 }
 0x119   : > { %v409_v33 = vpop.f32.mrf.mxu0  ;;  %v429_v34 = vpop.f32.mrf.mxu1 }
 0x11a   : > { %v410_v35 = vadd.f32 %v409_v33, %v379_v22  ;;  %v430_v36 = vadd.f32 %v429_v34, %v379_v22 }
 0x11c   : > { %v433_v37 = vmax.f32 %v430_v36, 0.0  ;;  %v432_v38 = vmax.f32 %v410_v35, 0.0 }
 0x11e   : > { %v436_v39 = vrot.slane %v433_v37, 4 }
 0x120   : > { %v437_v40 = vsel %vm385_vm0, %v432_v38, %v436_v39 }
 0x121   : > { %439 = vst [vmem:[%s329_s11] sm:$0xff] %v437_v40 }
 0x122   : > { %823 = shalt.err (!%p820_p13)
}
 0x123   : > { %702 = dma.vmem_to_hbm [thread:$0]  (%p968_p4), %s539_s20, 128, %s541_s21, %s518_s0  }
 0x124 PF: > { %p713_p0 = scmp.ge.s32.totalorder %s878_s10, 2  ;;  %s571_s12 = sand.u32 1, %s858_s27  }
 0x125   : > { %s572_s19 = scalar_lea.sflag [#allocation3], %s571_s12 }
 0x126   : > { %p707_p1 = pnand %p713_p0, %p975_p8 }
 0x128   : > { %p708_p2 = pneg %p707_p1 }
 0x12a   : > { %849 = dma.done.wait (%p708_p2), %s572_s19, 128  }
 0x12b   : > { %851 = vsyncadd (%p708_p2), %s572_s19, 4294967168  ;;  %s582_s14 = scalar_lea.sflag [#allocation5], %s571_s12 }
 0x12c   : > { %853 = dma.done.wait (%p708_p2), %s582_s14, 512  }
 0x12d   : > { %855 = vsyncadd (%p708_p2), %s582_s14, 4294966784  ;;  %s25_s10 = sadd.s32 1, %s878_s10   ;;  %s1097_s27 = smov %s862_s28 }
 0x12e   : > { %p22_p3 = scmp.ge.s32.totalorder %s25_s10, 4   ;;  %s1098_s28 = smov %s866_s29 }
 0x12f   : > { %s1099_s29 = smov %s981_s18  ;;  %s1100_s30 = smov %s874_s9 }
 0x130   : > { %s1101_s9 = smov %s1103_s13  ;;  %24 = sbr.rel (!%p22_p3) target bundleno = 10 (0xa), region = 100 }
 0x135   :  { %588 = vsyncpa [#allocation3], 1 }
 0x136   :  { %590 = vsyncpa [#allocation3 + $0x1], 1 }
 0x137   :  { %591 = vsyncpa [#allocation5], 1 }
 0x138   :  { %593 = vsyncpa [#allocation5 + $0x1], 1 }

</bundles_post_ra>
